<compile_context>
chip_gen: v7x
topology: tpu7x:2x2x1
jax: 0.10.0
libtpu: 0.0.40
codegen_flags: <defaults>
</compile_context>

<pallas_src>
import jax
import jax.numpy as jnp
from jax.experimental import pallas as pl
from jax.experimental.pallas import tpu as pltpu


# (in_ch, out_ch, kernel, stride, padding) — fixed by the PyTorch module.
_LAYER_CFG = [
    (1, 2, 3, 1, 0),
    (2, 4, 5, 2, 2),
    (4, 8, 1, 1, 0),
]
_C_OUT_FINAL = 8

# Static offsets into the single flat parameter vector (f32[92] in SMEM).
_W1, _B1 = 0, 6          # w1: (2,1,3) -> 6,   b1: 2
_W2, _B2 = 8, 48         # w2: (4,2,5) -> 40,  b2: 4
_W3, _B3 = 52, 84        # w3: (8,4,1) -> 32,  b3: 8
_P_TOTAL = 92


def _fused_net_kernel(x_ref, p_ref, o_ref):
    """Fused 3-layer conv stack.

    x_ref : (2, N, L/2) f32 VMEM -- stacked even / odd input samples
            x_ref[0, :, j] = x[2j],  x_ref[1, :, j] = x[2j+1]
    p_ref : (92,) f32 SMEM       -- all weights/biases, static offsets
    o_ref : (8, N, L_out) f32 VMEM -- per-channel output slab (CNL)
    """
    _, n, h = x_ref.shape          # h = L_in // 2
    l2 = h - 1                     # layer-1 half length == layer-2/3 out length

    xe = x_ref[0]                  # (N, h) even samples x[2j]
    xo = x_ref[1]                  # (N, h) odd samples  x[2j+1]

    xe0 = xe[:, 0:l2]              # x[2j]
    xo0 = xo[:, 0:l2]              # x[2j+1]
    xe1 = xe[:, 1:h]               # x[2j+2]
    xo1 = xo[:, 1:h]               # x[2j+3]

    # ---- layer 1: Conv1d(1->2, k=3, s=1, p=0), output kept as even/odd halves
    h_even = []                    # h1[ci][2j]
    h_odd = []                     # h1[ci][2j+1]
    for co in range(2):
        w0 = p_ref[_W1 + co * 3 + 0]
        w1 = p_ref[_W1 + co * 3 + 1]
        w2 = p_ref[_W1 + co * 3 + 2]
        b = p_ref[_B1 + co]
        h_even.append(w0 * xe0 + w1 * xo0 + w2 * xe1 + b)
        h_odd.append(w0 * xo0 + w1 * xe1 + w2 * xo1 + b)

    # ---- layer 2: Conv1d(2->4, k=5, s=2, p=2)
    # output o reads padded index 2o+k; in even/odd terms the 5 taps are
    #   k=0 -> even[o-1], k=1 -> odd[o-1], k=2 -> even[o],
    #   k=3 -> odd[o],    k=4 -> even[o+1]      (out of range -> zero padding)
    zcol = jnp.zeros((n, 1), jnp.float32)
    taps = []
    for ci in range(2):
        e, o = h_even[ci], h_odd[ci]
        e_r = jnp.concatenate([zcol, e[:, 0:l2 - 1]], axis=1)   # even[o-1]
        o_r = jnp.concatenate([zcol, o[:, 0:l2 - 1]], axis=1)   # odd[o-1]
        e_l = jnp.concatenate([e[:, 1:l2], zcol], axis=1)       # even[o+1]
        taps.append((e_r, o_r, e, o, e_l))

    y2 = []
    for co in range(4):
        # fold the bias into the first tap -- no zeros splat
        acc = taps[0][0] * p_ref[_W2 + co * 10] + p_ref[_B2 + co]
        for ci in range(2):
            for k in range(5):
                if ci == 0 and k == 0:
                    continue
                acc = acc + p_ref[_W2 + co * 10 + ci * 5 + k] * taps[ci][k]
        y2.append(acc)

    # ---- layer 3: Conv1d(4->8, k=1, s=1, p=0)  (pointwise), per-channel store
    for co in range(8):
        acc = y2[0] * p_ref[_W3 + co * 4] + p_ref[_B3 + co]
        for ci in range(1, 4):
            acc = acc + p_ref[_W3 + co * 4 + ci] * y2[ci]
        o_ref[co] = acc


def _network_pallas_fn(x_ncl, w1, b1, w2, b2, w3, b3):
    """x_ncl: (N, 1, L) float, L even. Returns (N, 8, (L-2)//2) in NCL."""
    n, c_in, l_in = x_ncl.shape
    assert c_in == 1 and l_in % 2 == 0 and l_in >= 6, (c_in, l_in)
    h = l_in // 2
    l2 = h - 1

    x = x_ncl[:, 0, :].astype(jnp.float32)                     # (N, L)
    # single stacked VMEM operand: (2, N, L/2) even/odd samples
    x_stack = jnp.stack([x[:, 0::2], x[:, 1::2]], axis=0)

    # single flat SMEM parameter vector: f32[92]
    p_flat = jnp.concatenate([
        w1.reshape(-1), b1.reshape(-1),
        w2.reshape(-1), b2.reshape(-1),
        w3.reshape(-1), b3.reshape(-1),
    ]).astype(jnp.float32)

    flops = 2 * n * (2 * 3 * (2 * l2) + 4 * 10 * l2 + 8 * 4 * l2)
    bytes_accessed = 4 * (n * l_in + n * _C_OUT_FINAL * l2 + _P_TOTAL)

    out_cnl = pl.pallas_call(
        _fused_net_kernel,
        out_shape=jax.ShapeDtypeStruct((_C_OUT_FINAL, n, l2), jnp.float32),
        in_specs=[
            pl.BlockSpec(memory_space=pltpu.MemorySpace.VMEM),   # x_stack
            pl.BlockSpec(memory_space=pltpu.MemorySpace.SMEM),   # p_flat (92,)
        ],
        out_specs=pl.BlockSpec(memory_space=pltpu.MemorySpace.VMEM),
        cost_estimate=pl.CostEstimate(
            flops=flops, transcendentals=0, bytes_accessed=bytes_accessed),
    )(x_stack, p_flat)

    # tiny (448 B) transpose back to PyTorch NCL layout
    return out_cnl.transpose(1, 0, 2)


network_pallas = jax.jit(_network_pallas_fn)


# ---------------------------------------------------------------------------
# Deterministic PyTorch-Conv1d-style parameter init.
# ---------------------------------------------------------------------------
def init_params(key):
    ps = []
    for (c_in, c_out, k, _s, _p) in _LAYER_CFG:
        key, kw, kb = jax.random.split(key, 3)
        bound = 1.0 / (c_in * k) ** 0.5
        w = jax.random.uniform(kw, (c_out, c_in, k), jnp.float32,
                               minval=-bound, maxval=bound)
        b = jax.random.uniform(kb, (c_out,), jnp.float32,
                               minval=-bound, maxval=bound)
        ps += [w, b]
    return tuple(ps)    # (w1, b1, w2, b2, w3, b3)


def network_reference(x_ncl, params):
    """Plain-JAX reference identical to the PyTorch Conv1d stack (NCL)."""
    w1, b1, w2, b2, w3, b3 = params
    y = x_ncl.astype(jnp.float32)
    for (w, b, cfg) in ((w1, b1, _LAYER_CFG[0]),
                        (w2, b2, _LAYER_CFG[1]),
                        (w3, b3, _LAYER_CFG[2])):
        _ci, _co, _k, s, p = cfg
        y = jax.lax.conv_general_dilated(
            y, w, window_strides=(s,), padding=[(p, p)],
            dimension_numbers=("NCH", "OIH", "NCH")) + b[None, :, None]
    return y


if __name__ == "__main__":
    key = jax.random.PRNGKey(0)
    kx, kp = jax.random.split(key)

    # Small input consistent with the module: (batch=2, channels=1, length=16)
    x = jax.random.normal(kx, (2, 1, 16), dtype=jnp.float32)
    params = init_params(kp)

    out = network_pallas(x, *params)
    out = jax.block_until_ready(out)

    ref = network_reference(x, params)
    assert out.shape == ref.shape == (2, 8, 7), (out.shape, ref.shape)
    assert jnp.allclose(out, ref, atol=1e-5, rtol=1e-5), "mismatch vs reference"

    print("KERNEL_OK")
</pallas_src>

<mosaic_0001>
module attributes {stable_mosaic.version = 11 : i64} {
  func.func @_fused_net_kernel(%arg0: memref<2x2x8xf32, #tpu.memory_space<vmem>>, %arg1: memref<92xf32, #tpu.memory_space<smem>>, %arg2: memref<8x2x7xf32, #tpu.memory_space<vmem>>) attributes {dimension_semantics = [], scalar_prefetch = 0 : i64, scratch_operands = 0 : i64, tpu.core_type = #tpu.core_type<tc>} {
    %c0 = arith.constant 0 : index
    %c0_0 = arith.constant 0 : index
    %c0_1 = arith.constant 0 : index
    %0 = vector.load %arg0[%c0, %c0_0, %c0_1] : memref<2x2x8xf32, #tpu.memory_space<vmem>>, vector<1x2x8xf32>
    %1 = vector.shape_cast %0 : vector<1x2x8xf32> to vector<2x8xf32>
    %c1 = arith.constant 1 : index
    %c0_2 = arith.constant 0 : index
    %c0_3 = arith.constant 0 : index
    %2 = vector.load %arg0[%c1, %c0_2, %c0_3] : memref<2x2x8xf32, #tpu.memory_space<vmem>>, vector<1x2x8xf32>
    %3 = vector.shape_cast %2 : vector<1x2x8xf32> to vector<2x8xf32>
    %4 = vector.extract_strided_slice %1 {offsets = [0, 0], sizes = [2, 7], strides = [1, 1]} : vector<2x8xf32> to vector<2x7xf32>
    %5 = vector.extract_strided_slice %3 {offsets = [0, 0], sizes = [2, 7], strides = [1, 1]} : vector<2x8xf32> to vector<2x7xf32>
    %6 = vector.extract_strided_slice %1 {offsets = [0, 1], sizes = [2, 7], strides = [1, 1]} : vector<2x8xf32> to vector<2x7xf32>
    %7 = vector.extract_strided_slice %3 {offsets = [0, 1], sizes = [2, 7], strides = [1, 1]} : vector<2x8xf32> to vector<2x7xf32>
    %c0_4 = arith.constant 0 : index
    %8 = memref.load %arg1[%c0_4] : memref<92xf32, #tpu.memory_space<smem>>
    %c1_5 = arith.constant 1 : index
    %9 = memref.load %arg1[%c1_5] : memref<92xf32, #tpu.memory_space<smem>>
    %c2 = arith.constant 2 : index
    %10 = memref.load %arg1[%c2] : memref<92xf32, #tpu.memory_space<smem>>
    %c6 = arith.constant 6 : index
    %11 = memref.load %arg1[%c6] : memref<92xf32, #tpu.memory_space<smem>>
    %12 = vector.broadcast %8 : f32 to vector<2x7xf32>
    %13 = arith.mulf %12, %4 : vector<2x7xf32>
    %14 = vector.broadcast %9 : f32 to vector<2x7xf32>
    %15 = arith.mulf %14, %5 : vector<2x7xf32>
    %16 = arith.addf %13, %15 : vector<2x7xf32>
    %17 = vector.broadcast %10 : f32 to vector<2x7xf32>
    %18 = arith.mulf %17, %6 : vector<2x7xf32>
    %19 = arith.addf %16, %18 : vector<2x7xf32>
    %20 = vector.broadcast %11 : f32 to vector<2x7xf32>
    %21 = arith.addf %19, %20 : vector<2x7xf32>
    %22 = vector.broadcast %8 : f32 to vector<2x7xf32>
    %23 = arith.mulf %22, %5 : vector<2x7xf32>
    %24 = vector.broadcast %9 : f32 to vector<2x7xf32>
    %25 = arith.mulf %24, %6 : vector<2x7xf32>
    %26 = arith.addf %23, %25 : vector<2x7xf32>
    %27 = vector.broadcast %10 : f32 to vector<2x7xf32>
    %28 = arith.mulf %27, %7 : vector<2x7xf32>
    %29 = arith.addf %26, %28 : vector<2x7xf32>
    %30 = vector.broadcast %11 : f32 to vector<2x7xf32>
    %31 = arith.addf %29, %30 : vector<2x7xf32>
    %c3 = arith.constant 3 : index
    %32 = memref.load %arg1[%c3] : memref<92xf32, #tpu.memory_space<smem>>
    %c4 = arith.constant 4 : index
    %33 = memref.load %arg1[%c4] : memref<92xf32, #tpu.memory_space<smem>>
    %c5 = arith.constant 5 : index
    %34 = memref.load %arg1[%c5] : memref<92xf32, #tpu.memory_space<smem>>
    %c7 = arith.constant 7 : index
    %35 = memref.load %arg1[%c7] : memref<92xf32, #tpu.memory_space<smem>>
    %36 = vector.broadcast %32 : f32 to vector<2x7xf32>
    %37 = arith.mulf %36, %4 : vector<2x7xf32>
    %38 = vector.broadcast %33 : f32 to vector<2x7xf32>
    %39 = arith.mulf %38, %5 : vector<2x7xf32>
    %40 = arith.addf %37, %39 : vector<2x7xf32>
    %41 = vector.broadcast %34 : f32 to vector<2x7xf32>
    %42 = arith.mulf %41, %6 : vector<2x7xf32>
    %43 = arith.addf %40, %42 : vector<2x7xf32>
    %44 = vector.broadcast %35 : f32 to vector<2x7xf32>
    %45 = arith.addf %43, %44 : vector<2x7xf32>
    %46 = vector.broadcast %32 : f32 to vector<2x7xf32>
    %47 = arith.mulf %46, %5 : vector<2x7xf32>
    %48 = vector.broadcast %33 : f32 to vector<2x7xf32>
    %49 = arith.mulf %48, %6 : vector<2x7xf32>
    %50 = arith.addf %47, %49 : vector<2x7xf32>
    %51 = vector.broadcast %34 : f32 to vector<2x7xf32>
    %52 = arith.mulf %51, %7 : vector<2x7xf32>
    %53 = arith.addf %50, %52 : vector<2x7xf32>
    %54 = vector.broadcast %35 : f32 to vector<2x7xf32>
    %55 = arith.addf %53, %54 : vector<2x7xf32>
    %cst = arith.constant 0.000000e+00 : f32
    %56 = vector.broadcast %cst : f32 to vector<2x1xf32>
    %57 = vector.extract_strided_slice %21 {offsets = [0, 0], sizes = [2, 6], strides = [1, 1]} : vector<2x7xf32> to vector<2x6xf32>
    %58 = tpu.concatenate %56, %57 in 1 : vector<2x1xf32>, vector<2x6xf32> -> vector<2x7xf32>
    %59 = vector.extract_strided_slice %31 {offsets = [0, 0], sizes = [2, 6], strides = [1, 1]} : vector<2x7xf32> to vector<2x6xf32>
    %60 = tpu.concatenate %56, %59 in 1 : vector<2x1xf32>, vector<2x6xf32> -> vector<2x7xf32>
    %61 = vector.extract_strided_slice %21 {offsets = [0, 1], sizes = [2, 6], strides = [1, 1]} : vector<2x7xf32> to vector<2x6xf32>
    %62 = tpu.concatenate %61, %56 in 1 : vector<2x6xf32>, vector<2x1xf32> -> vector<2x7xf32>
    %63 = vector.extract_strided_slice %45 {offsets = [0, 0], sizes = [2, 6], strides = [1, 1]} : vector<2x7xf32> to vector<2x6xf32>
    %64 = tpu.concatenate %56, %63 in 1 : vector<2x1xf32>, vector<2x6xf32> -> vector<2x7xf32>
    %65 = vector.extract_strided_slice %55 {offsets = [0, 0], sizes = [2, 6], strides = [1, 1]} : vector<2x7xf32> to vector<2x6xf32>
    %66 = tpu.concatenate %56, %65 in 1 : vector<2x1xf32>, vector<2x6xf32> -> vector<2x7xf32>
    %67 = vector.extract_strided_slice %45 {offsets = [0, 1], sizes = [2, 6], strides = [1, 1]} : vector<2x7xf32> to vector<2x6xf32>
    %68 = tpu.concatenate %67, %56 in 1 : vector<2x6xf32>, vector<2x1xf32> -> vector<2x7xf32>
    %c8 = arith.constant 8 : index
    %69 = memref.load %arg1[%c8] : memref<92xf32, #tpu.memory_space<smem>>
    %70 = vector.broadcast %69 : f32 to vector<2x7xf32>
    %71 = arith.mulf %58, %70 : vector<2x7xf32>
    %c48 = arith.constant 48 : index
    %72 = memref.load %arg1[%c48] : memref<92xf32, #tpu.memory_space<smem>>
    %73 = vector.broadcast %72 : f32 to vector<2x7xf32>
    %74 = arith.addf %71, %73 : vector<2x7xf32>
    %c9 = arith.constant 9 : index
    %75 = memref.load %arg1[%c9] : memref<92xf32, #tpu.memory_space<smem>>
    %76 = vector.broadcast %75 : f32 to vector<2x7xf32>
    %77 = arith.mulf %76, %60 : vector<2x7xf32>
    %78 = arith.addf %74, %77 : vector<2x7xf32>
    %c10 = arith.constant 10 : index
    %79 = memref.load %arg1[%c10] : memref<92xf32, #tpu.memory_space<smem>>
    %80 = vector.broadcast %79 : f32 to vector<2x7xf32>
    %81 = arith.mulf %80, %21 : vector<2x7xf32>
    %82 = arith.addf %78, %81 : vector<2x7xf32>
    %c11 = arith.constant 11 : index
    %83 = memref.load %arg1[%c11] : memref<92xf32, #tpu.memory_space<smem>>
    %84 = vector.broadcast %83 : f32 to vector<2x7xf32>
    %85 = arith.mulf %84, %31 : vector<2x7xf32>
    %86 = arith.addf %82, %85 : vector<2x7xf32>
    %c12 = arith.constant 12 : index
    %87 = memref.load %arg1[%c12] : memref<92xf32, #tpu.memory_space<smem>>
    %88 = vector.broadcast %87 : f32 to vector<2x7xf32>
    %89 = arith.mulf %88, %62 : vector<2x7xf32>
    %90 = arith.addf %86, %89 : vector<2x7xf32>
    %c13 = arith.constant 13 : index
    %91 = memref.load %arg1[%c13] : memref<92xf32, #tpu.memory_space<smem>>
    %92 = vector.broadcast %91 : f32 to vector<2x7xf32>
    %93 = arith.mulf %92, %64 : vector<2x7xf32>
    %94 = arith.addf %90, %93 : vector<2x7xf32>
    %c14 = arith.constant 14 : index
    %95 = memref.load %arg1[%c14] : memref<92xf32, #tpu.memory_space<smem>>
    %96 = vector.broadcast %95 : f32 to vector<2x7xf32>
    %97 = arith.mulf %96, %66 : vector<2x7xf32>
    %98 = arith.addf %94, %97 : vector<2x7xf32>
    %c15 = arith.constant 15 : index
    %99 = memref.load %arg1[%c15] : memref<92xf32, #tpu.memory_space<smem>>
    %100 = vector.broadcast %99 : f32 to vector<2x7xf32>
    %101 = arith.mulf %100, %45 : vector<2x7xf32>
    %102 = arith.addf %98, %101 : vector<2x7xf32>
    %c16 = arith.constant 16 : index
    %103 = memref.load %arg1[%c16] : memref<92xf32, #tpu.memory_space<smem>>
    %104 = vector.broadcast %103 : f32 to vector<2x7xf32>
    %105 = arith.mulf %104, %55 : vector<2x7xf32>
    %106 = arith.addf %102, %105 : vector<2x7xf32>
    %c17 = arith.constant 17 : index
    %107 = memref.load %arg1[%c17] : memref<92xf32, #tpu.memory_space<smem>>
    %108 = vector.broadcast %107 : f32 to vector<2x7xf32>
    %109 = arith.mulf %108, %68 : vector<2x7xf32>
    %110 = arith.addf %106, %109 : vector<2x7xf32>
    %c18 = arith.constant 18 : index
    %111 = memref.load %arg1[%c18] : memref<92xf32, #tpu.memory_space<smem>>
    %112 = vector.broadcast %111 : f32 to vector<2x7xf32>
    %113 = arith.mulf %58, %112 : vector<2x7xf32>
    %c49 = arith.constant 49 : index
    %114 = memref.load %arg1[%c49] : memref<92xf32, #tpu.memory_space<smem>>
    %115 = vector.broadcast %114 : f32 to vector<2x7xf32>
    %116 = arith.addf %113, %115 : vector<2x7xf32>
    %c19 = arith.constant 19 : index
    %117 = memref.load %arg1[%c19] : memref<92xf32, #tpu.memory_space<smem>>
    %118 = vector.broadcast %117 : f32 to vector<2x7xf32>
    %119 = arith.mulf %118, %60 : vector<2x7xf32>
    %120 = arith.addf %116, %119 : vector<2x7xf32>
    %c20 = arith.constant 20 : index
    %121 = memref.load %arg1[%c20] : memref<92xf32, #tpu.memory_space<smem>>
    %122 = vector.broadcast %121 : f32 to vector<2x7xf32>
    %123 = arith.mulf %122, %21 : vector<2x7xf32>
    %124 = arith.addf %120, %123 : vector<2x7xf32>
    %c21 = arith.constant 21 : index
    %125 = memref.load %arg1[%c21] : memref<92xf32, #tpu.memory_space<smem>>
    %126 = vector.broadcast %125 : f32 to vector<2x7xf32>
    %127 = arith.mulf %126, %31 : vector<2x7xf32>
    %128 = arith.addf %124, %127 : vector<2x7xf32>
    %c22 = arith.constant 22 : index
    %129 = memref.load %arg1[%c22] : memref<92xf32, #tpu.memory_space<smem>>
    %130 = vector.broadcast %129 : f32 to vector<2x7xf32>
    %131 = arith.mulf %130, %62 : vector<2x7xf32>
    %132 = arith.addf %128, %131 : vector<2x7xf32>
    %c23 = arith.constant 23 : index
    %133 = memref.load %arg1[%c23] : memref<92xf32, #tpu.memory_space<smem>>
    %134 = vector.broadcast %133 : f32 to vector<2x7xf32>
    %135 = arith.mulf %134, %64 : vector<2x7xf32>
    %136 = arith.addf %132, %135 : vector<2x7xf32>
    %c24 = arith.constant 24 : index
    %137 = memref.load %arg1[%c24] : memref<92xf32, #tpu.memory_space<smem>>
    %138 = vector.broadcast %137 : f32 to vector<2x7xf32>
    %139 = arith.mulf %138, %66 : vector<2x7xf32>
    %140 = arith.addf %136, %139 : vector<2x7xf32>
    %c25 = arith.constant 25 : index
    %141 = memref.load %arg1[%c25] : memref<92xf32, #tpu.memory_space<smem>>
    %142 = vector.broadcast %141 : f32 to vector<2x7xf32>
    %143 = arith.mulf %142, %45 : vector<2x7xf32>
    %144 = arith.addf %140, %143 : vector<2x7xf32>
    %c26 = arith.constant 26 : index
    %145 = memref.load %arg1[%c26] : memref<92xf32, #tpu.memory_space<smem>>
    %146 = vector.broadcast %145 : f32 to vector<2x7xf32>
    %147 = arith.mulf %146, %55 : vector<2x7xf32>
    %148 = arith.addf %144, %147 : vector<2x7xf32>
    %c27 = arith.constant 27 : index
    %149 = memref.load %arg1[%c27] : memref<92xf32, #tpu.memory_space<smem>>
    %150 = vector.broadcast %149 : f32 to vector<2x7xf32>
    %151 = arith.mulf %150, %68 : vector<2x7xf32>
    %152 = arith.addf %148, %151 : vector<2x7xf32>
    %c28 = arith.constant 28 : index
    %153 = memref.load %arg1[%c28] : memref<92xf32, #tpu.memory_space<smem>>
    %154 = vector.broadcast %153 : f32 to vector<2x7xf32>
    %155 = arith.mulf %58, %154 : vector<2x7xf32>
    %c50 = arith.constant 50 : index
    %156 = memref.load %arg1[%c50] : memref<92xf32, #tpu.memory_space<smem>>
    %157 = vector.broadcast %156 : f32 to vector<2x7xf32>
    %158 = arith.addf %155, %157 : vector<2x7xf32>
    %c29 = arith.constant 29 : index
    %159 = memref.load %arg1[%c29] : memref<92xf32, #tpu.memory_space<smem>>
    %160 = vector.broadcast %159 : f32 to vector<2x7xf32>
    %161 = arith.mulf %160, %60 : vector<2x7xf32>
    %162 = arith.addf %158, %161 : vector<2x7xf32>
    %c30 = arith.constant 30 : index
    %163 = memref.load %arg1[%c30] : memref<92xf32, #tpu.memory_space<smem>>
    %164 = vector.broadcast %163 : f32 to vector<2x7xf32>
    %165 = arith.mulf %164, %21 : vector<2x7xf32>
    %166 = arith.addf %162, %165 : vector<2x7xf32>
    %c31 = arith.constant 31 : index
    %167 = memref.load %arg1[%c31] : memref<92xf32, #tpu.memory_space<smem>>
    %168 = vector.broadcast %167 : f32 to vector<2x7xf32>
    %169 = arith.mulf %168, %31 : vector<2x7xf32>
    %170 = arith.addf %166, %169 : vector<2x7xf32>
    %c32 = arith.constant 32 : index
    %171 = memref.load %arg1[%c32] : memref<92xf32, #tpu.memory_space<smem>>
    %172 = vector.broadcast %171 : f32 to vector<2x7xf32>
    %173 = arith.mulf %172, %62 : vector<2x7xf32>
    %174 = arith.addf %170, %173 : vector<2x7xf32>
    %c33 = arith.constant 33 : index
    %175 = memref.load %arg1[%c33] : memref<92xf32, #tpu.memory_space<smem>>
    %176 = vector.broadcast %175 : f32 to vector<2x7xf32>
    %177 = arith.mulf %176, %64 : vector<2x7xf32>
    %178 = arith.addf %174, %177 : vector<2x7xf32>
    %c34 = arith.constant 34 : index
    %179 = memref.load %arg1[%c34] : memref<92xf32, #tpu.memory_space<smem>>
    %180 = vector.broadcast %179 : f32 to vector<2x7xf32>
    %181 = arith.mulf %180, %66 : vector<2x7xf32>
    %182 = arith.addf %178, %181 : vector<2x7xf32>
    %c35 = arith.constant 35 : index
    %183 = memref.load %arg1[%c35] : memref<92xf32, #tpu.memory_space<smem>>
    %184 = vector.broadcast %183 : f32 to vector<2x7xf32>
    %185 = arith.mulf %184, %45 : vector<2x7xf32>
    %186 = arith.addf %182, %185 : vector<2x7xf32>
    %c36 = arith.constant 36 : index
    %187 = memref.load %arg1[%c36] : memref<92xf32, #tpu.memory_space<smem>>
    %188 = vector.broadcast %187 : f32 to vector<2x7xf32>
    %189 = arith.mulf %188, %55 : vector<2x7xf32>
    %190 = arith.addf %186, %189 : vector<2x7xf32>
    %c37 = arith.constant 37 : index
    %191 = memref.load %arg1[%c37] : memref<92xf32, #tpu.memory_space<smem>>
    %192 = vector.broadcast %191 : f32 to vector<2x7xf32>
    %193 = arith.mulf %192, %68 : vector<2x7xf32>
    %194 = arith.addf %190, %193 : vector<2x7xf32>
    %c38 = arith.constant 38 : index
    %195 = memref.load %arg1[%c38] : memref<92xf32, #tpu.memory_space<smem>>
    %196 = vector.broadcast %195 : f32 to vector<2x7xf32>
    %197 = arith.mulf %58, %196 : vector<2x7xf32>
    %c51 = arith.constant 51 : index
    %198 = memref.load %arg1[%c51] : memref<92xf32, #tpu.memory_space<smem>>
    %199 = vector.broadcast %198 : f32 to vector<2x7xf32>
    %200 = arith.addf %197, %199 : vector<2x7xf32>
    %c39 = arith.constant 39 : index
    %201 = memref.load %arg1[%c39] : memref<92xf32, #tpu.memory_space<smem>>
    %202 = vector.broadcast %201 : f32 to vector<2x7xf32>
    %203 = arith.mulf %202, %60 : vector<2x7xf32>
    %204 = arith.addf %200, %203 : vector<2x7xf32>
    %c40 = arith.constant 40 : index
    %205 = memref.load %arg1[%c40] : memref<92xf32, #tpu.memory_space<smem>>
    %206 = vector.broadcast %205 : f32 to vector<2x7xf32>
    %207 = arith.mulf %206, %21 : vector<2x7xf32>
    %208 = arith.addf %204, %207 : vector<2x7xf32>
    %c41 = arith.constant 41 : index
    %209 = memref.load %arg1[%c41] : memref<92xf32, #tpu.memory_space<smem>>
    %210 = vector.broadcast %209 : f32 to vector<2x7xf32>
    %211 = arith.mulf %210, %31 : vector<2x7xf32>
    %212 = arith.addf %208, %211 : vector<2x7xf32>
    %c42 = arith.constant 42 : index
    %213 = memref.load %arg1[%c42] : memref<92xf32, #tpu.memory_space<smem>>
    %214 = vector.broadcast %213 : f32 to vector<2x7xf32>
    %215 = arith.mulf %214, %62 : vector<2x7xf32>
    %216 = arith.addf %212, %215 : vector<2x7xf32>
    %c43 = arith.constant 43 : index
    %217 = memref.load %arg1[%c43] : memref<92xf32, #tpu.memory_space<smem>>
    %218 = vector.broadcast %217 : f32 to vector<2x7xf32>
    %219 = arith.mulf %218, %64 : vector<2x7xf32>
    %220 = arith.addf %216, %219 : vector<2x7xf32>
    %c44 = arith.constant 44 : index
    %221 = memref.load %arg1[%c44] : memref<92xf32, #tpu.memory_space<smem>>
    %222 = vector.broadcast %221 : f32 to vector<2x7xf32>
    %223 = arith.mulf %222, %66 : vector<2x7xf32>
    %224 = arith.addf %220, %223 : vector<2x7xf32>
    %c45 = arith.constant 45 : index
    %225 = memref.load %arg1[%c45] : memref<92xf32, #tpu.memory_space<smem>>
    %226 = vector.broadcast %225 : f32 to vector<2x7xf32>
    %227 = arith.mulf %226, %45 : vector<2x7xf32>
    %228 = arith.addf %224, %227 : vector<2x7xf32>
    %c46 = arith.constant 46 : index
    %229 = memref.load %arg1[%c46] : memref<92xf32, #tpu.memory_space<smem>>
    %230 = vector.broadcast %229 : f32 to vector<2x7xf32>
    %231 = arith.mulf %230, %55 : vector<2x7xf32>
    %232 = arith.addf %228, %231 : vector<2x7xf32>
    %c47 = arith.constant 47 : index
    %233 = memref.load %arg1[%c47] : memref<92xf32, #tpu.memory_space<smem>>
    %234 = vector.broadcast %233 : f32 to vector<2x7xf32>
    %235 = arith.mulf %234, %68 : vector<2x7xf32>
    %236 = arith.addf %232, %235 : vector<2x7xf32>
    %c52 = arith.constant 52 : index
    %237 = memref.load %arg1[%c52] : memref<92xf32, #tpu.memory_space<smem>>
    %238 = vector.broadcast %237 : f32 to vector<2x7xf32>
    %239 = arith.mulf %110, %238 : vector<2x7xf32>
    %c84 = arith.constant 84 : index
    %240 = memref.load %arg1[%c84] : memref<92xf32, #tpu.memory_space<smem>>
    %241 = vector.broadcast %240 : f32 to vector<2x7xf32>
    %242 = arith.addf %239, %241 : vector<2x7xf32>
    %c53 = arith.constant 53 : index
    %243 = memref.load %arg1[%c53] : memref<92xf32, #tpu.memory_space<smem>>
    %244 = vector.broadcast %243 : f32 to vector<2x7xf32>
    %245 = arith.mulf %244, %152 : vector<2x7xf32>
    %246 = arith.addf %242, %245 : vector<2x7xf32>
    %c54 = arith.constant 54 : index
    %247 = memref.load %arg1[%c54] : memref<92xf32, #tpu.memory_space<smem>>
    %248 = vector.broadcast %247 : f32 to vector<2x7xf32>
    %249 = arith.mulf %248, %194 : vector<2x7xf32>
    %250 = arith.addf %246, %249 : vector<2x7xf32>
    %c55 = arith.constant 55 : index
    %251 = memref.load %arg1[%c55] : memref<92xf32, #tpu.memory_space<smem>>
    %252 = vector.broadcast %251 : f32 to vector<2x7xf32>
    %253 = arith.mulf %252, %236 : vector<2x7xf32>
    %254 = arith.addf %250, %253 : vector<2x7xf32>
    %c0_6 = arith.constant 0 : index
    %c0_7 = arith.constant 0 : index
    %c0_8 = arith.constant 0 : index
    %255 = vector.load %arg2[%c0_6, %c0_7, %c0_8] : memref<8x2x7xf32, #tpu.memory_space<vmem>>, vector<1x2x7xf32>
    %256 = vector.shape_cast %255 : vector<1x2x7xf32> to vector<2x7xf32>
    %257 = vector.shape_cast %254 : vector<2x7xf32> to vector<1x2x7xf32>
    tpu.vector_store %arg2[%c0_6, %c0_7, %c0_8], %257 {strides = array<i32>} : memref<8x2x7xf32, #tpu.memory_space<vmem>>, vector<1x2x7xf32>,
    %c56 = arith.constant 56 : index
    %258 = memref.load %arg1[%c56] : memref<92xf32, #tpu.memory_space<smem>>
    %259 = vector.broadcast %258 : f32 to vector<2x7xf32>
    %260 = arith.mulf %110, %259 : vector<2x7xf32>
    %c85 = arith.constant 85 : index
    %261 = memref.load %arg1[%c85] : memref<92xf32, #tpu.memory_space<smem>>
    %262 = vector.broadcast %261 : f32 to vector<2x7xf32>
    %263 = arith.addf %260, %262 : vector<2x7xf32>
    %c57 = arith.constant 57 : index
    %264 = memref.load %arg1[%c57] : memref<92xf32, #tpu.memory_space<smem>>
    %265 = vector.broadcast %264 : f32 to vector<2x7xf32>
    %266 = arith.mulf %265, %152 : vector<2x7xf32>
    %267 = arith.addf %263, %266 : vector<2x7xf32>
    %c58 = arith.constant 58 : index
    %268 = memref.load %arg1[%c58] : memref<92xf32, #tpu.memory_space<smem>>
    %269 = vector.broadcast %268 : f32 to vector<2x7xf32>
    %270 = arith.mulf %269, %194 : vector<2x7xf32>
    %271 = arith.addf %267, %270 : vector<2x7xf32>
    %c59 = arith.constant 59 : index
    %272 = memref.load %arg1[%c59] : memref<92xf32, #tpu.memory_space<smem>>
    %273 = vector.broadcast %272 : f32 to vector<2x7xf32>
    %274 = arith.mulf %273, %236 : vector<2x7xf32>
    %275 = arith.addf %271, %274 : vector<2x7xf32>
    %c1_9 = arith.constant 1 : index
    %c0_10 = arith.constant 0 : index
    %c0_11 = arith.constant 0 : index
    %276 = vector.load %arg2[%c1_9, %c0_10, %c0_11] : memref<8x2x7xf32, #tpu.memory_space<vmem>>, vector<1x2x7xf32>
    %277 = vector.shape_cast %276 : vector<1x2x7xf32> to vector<2x7xf32>
    %278 = vector.shape_cast %275 : vector<2x7xf32> to vector<1x2x7xf32>
    tpu.vector_store %arg2[%c1_9, %c0_10, %c0_11], %278 {strides = array<i32>} : memref<8x2x7xf32, #tpu.memory_space<vmem>>, vector<1x2x7xf32>,
    %c60 = arith.constant 60 : index
    %279 = memref.load %arg1[%c60] : memref<92xf32, #tpu.memory_space<smem>>
    %280 = vector.broadcast %279 : f32 to vector<2x7xf32>
    %281 = arith.mulf %110, %280 : vector<2x7xf32>
    %c86 = arith.constant 86 : index
    %282 = memref.load %arg1[%c86] : memref<92xf32, #tpu.memory_space<smem>>
    %283 = vector.broadcast %282 : f32 to vector<2x7xf32>
    %284 = arith.addf %281, %283 : vector<2x7xf32>
    %c61 = arith.constant 61 : index
    %285 = memref.load %arg1[%c61] : memref<92xf32, #tpu.memory_space<smem>>
    %286 = vector.broadcast %285 : f32 to vector<2x7xf32>
    %287 = arith.mulf %286, %152 : vector<2x7xf32>
    %288 = arith.addf %284, %287 : vector<2x7xf32>
    %c62 = arith.constant 62 : index
    %289 = memref.load %arg1[%c62] : memref<92xf32, #tpu.memory_space<smem>>
    %290 = vector.broadcast %289 : f32 to vector<2x7xf32>
    %291 = arith.mulf %290, %194 : vector<2x7xf32>
    %292 = arith.addf %288, %291 : vector<2x7xf32>
    %c63 = arith.constant 63 : index
    %293 = memref.load %arg1[%c63] : memref<92xf32, #tpu.memory_space<smem>>
    %294 = vector.broadcast %293 : f32 to vector<2x7xf32>
    %295 = arith.mulf %294, %236 : vector<2x7xf32>
    %296 = arith.addf %292, %295 : vector<2x7xf32>
    %c2_12 = arith.constant 2 : index
    %c0_13 = arith.constant 0 : index
    %c0_14 = arith.constant 0 : index
    %297 = vector.load %arg2[%c2_12, %c0_13, %c0_14] : memref<8x2x7xf32, #tpu.memory_space<vmem>>, vector<1x2x7xf32>
    %298 = vector.shape_cast %297 : vector<1x2x7xf32> to vector<2x7xf32>
    %299 = vector.shape_cast %296 : vector<2x7xf32> to vector<1x2x7xf32>
    tpu.vector_store %arg2[%c2_12, %c0_13, %c0_14], %299 {strides = array<i32>} : memref<8x2x7xf32, #tpu.memory_space<vmem>>, vector<1x2x7xf32>,
    %c64 = arith.constant 64 : index
    %300 = memref.load %arg1[%c64] : memref<92xf32, #tpu.memory_space<smem>>
    %301 = vector.broadcast %300 : f32 to vector<2x7xf32>
    %302 = arith.mulf %110, %301 : vector<2x7xf32>
    %c87 = arith.constant 87 : index
    %303 = memref.load %arg1[%c87] : memref<92xf32, #tpu.memory_space<smem>>
    %304 = vector.broadcast %303 : f32 to vector<2x7xf32>
    %305 = arith.addf %302, %304 : vector<2x7xf32>
    %c65 = arith.constant 65 : index
    %306 = memref.load %arg1[%c65] : memref<92xf32, #tpu.memory_space<smem>>
    %307 = vector.broadcast %306 : f32 to vector<2x7xf32>
    %308 = arith.mulf %307, %152 : vector<2x7xf32>
    %309 = arith.addf %305, %308 : vector<2x7xf32>
    %c66 = arith.constant 66 : index
    %310 = memref.load %arg1[%c66] : memref<92xf32, #tpu.memory_space<smem>>
    %311 = vector.broadcast %310 : f32 to vector<2x7xf32>
    %312 = arith.mulf %311, %194 : vector<2x7xf32>
    %313 = arith.addf %309, %312 : vector<2x7xf32>
    %c67 = arith.constant 67 : index
    %314 = memref.load %arg1[%c67] : memref<92xf32, #tpu.memory_space<smem>>
    %315 = vector.broadcast %314 : f32 to vector<2x7xf32>
    %316 = arith.mulf %315, %236 : vector<2x7xf32>
    %317 = arith.addf %313, %316 : vector<2x7xf32>
    %c3_15 = arith.constant 3 : index
    %c0_16 = arith.constant 0 : index
    %c0_17 = arith.constant 0 : index
    %318 = vector.load %arg2[%c3_15, %c0_16, %c0_17] : memref<8x2x7xf32, #tpu.memory_space<vmem>>, vector<1x2x7xf32>
    %319 = vector.shape_cast %318 : vector<1x2x7xf32> to vector<2x7xf32>
    %320 = vector.shape_cast %317 : vector<2x7xf32> to vector<1x2x7xf32>
    tpu.vector_store %arg2[%c3_15, %c0_16, %c0_17], %320 {strides = array<i32>} : memref<8x2x7xf32, #tpu.memory_space<vmem>>, vector<1x2x7xf32>,
    %c68 = arith.constant 68 : index
    %321 = memref.load %arg1[%c68] : memref<92xf32, #tpu.memory_space<smem>>
    %322 = vector.broadcast %321 : f32 to vector<2x7xf32>
    %323 = arith.mulf %110, %322 : vector<2x7xf32>
    %c88 = arith.constant 88 : index
    %324 = memref.load %arg1[%c88] : memref<92xf32, #tpu.memory_space<smem>>
    %325 = vector.broadcast %324 : f32 to vector<2x7xf32>
    %326 = arith.addf %323, %325 : vector<2x7xf32>
    %c69 = arith.constant 69 : index
    %327 = memref.load %arg1[%c69] : memref<92xf32, #tpu.memory_space<smem>>
    %328 = vector.broadcast %327 : f32 to vector<2x7xf32>
    %329 = arith.mulf %328, %152 : vector<2x7xf32>
    %330 = arith.addf %326, %329 : vector<2x7xf32>
    %c70 = arith.constant 70 : index
    %331 = memref.load %arg1[%c70] : memref<92xf32, #tpu.memory_space<smem>>
    %332 = vector.broadcast %331 : f32 to vector<2x7xf32>
    %333 = arith.mulf %332, %194 : vector<2x7xf32>
    %334 = arith.addf %330, %333 : vector<2x7xf32>
    %c71 = arith.constant 71 : index
    %335 = memref.load %arg1[%c71] : memref<92xf32, #tpu.memory_space<smem>>
    %336 = vector.broadcast %335 : f32 to vector<2x7xf32>
    %337 = arith.mulf %336, %236 : vector<2x7xf32>
    %338 = arith.addf %334, %337 : vector<2x7xf32>
    %c4_18 = arith.constant 4 : index
    %c0_19 = arith.constant 0 : index
    %c0_20 = arith.constant 0 : index
    %339 = vector.load %arg2[%c4_18, %c0_19, %c0_20] : memref<8x2x7xf32, #tpu.memory_space<vmem>>, vector<1x2x7xf32>
    %340 = vector.shape_cast %339 : vector<1x2x7xf32> to vector<2x7xf32>
    %341 = vector.shape_cast %338 : vector<2x7xf32> to vector<1x2x7xf32>
    tpu.vector_store %arg2[%c4_18, %c0_19, %c0_20], %341 {strides = array<i32>} : memref<8x2x7xf32, #tpu.memory_space<vmem>>, vector<1x2x7xf32>,
    %c72 = arith.constant 72 : index
    %342 = memref.load %arg1[%c72] : memref<92xf32, #tpu.memory_space<smem>>
    %343 = vector.broadcast %342 : f32 to vector<2x7xf32>
    %344 = arith.mulf %110, %343 : vector<2x7xf32>
    %c89 = arith.constant 89 : index
    %345 = memref.load %arg1[%c89] : memref<92xf32, #tpu.memory_space<smem>>
    %346 = vector.broadcast %345 : f32 to vector<2x7xf32>
    %347 = arith.addf %344, %346 : vector<2x7xf32>
    %c73 = arith.constant 73 : index
    %348 = memref.load %arg1[%c73] : memref<92xf32, #tpu.memory_space<smem>>
    %349 = vector.broadcast %348 : f32 to vector<2x7xf32>
    %350 = arith.mulf %349, %152 : vector<2x7xf32>
    %351 = arith.addf %347, %350 : vector<2x7xf32>
    %c74 = arith.constant 74 : index
    %352 = memref.load %arg1[%c74] : memref<92xf32, #tpu.memory_space<smem>>
    %353 = vector.broadcast %352 : f32 to vector<2x7xf32>
    %354 = arith.mulf %353, %194 : vector<2x7xf32>
    %355 = arith.addf %351, %354 : vector<2x7xf32>
    %c75 = arith.constant 75 : index
    %356 = memref.load %arg1[%c75] : memref<92xf32, #tpu.memory_space<smem>>
    %357 = vector.broadcast %356 : f32 to vector<2x7xf32>
    %358 = arith.mulf %357, %236 : vector<2x7xf32>
    %359 = arith.addf %355, %358 : vector<2x7xf32>
    %c5_21 = arith.constant 5 : index
    %c0_22 = arith.constant 0 : index
    %c0_23 = arith.constant 0 : index
    %360 = vector.load %arg2[%c5_21, %c0_22, %c0_23] : memref<8x2x7xf32, #tpu.memory_space<vmem>>, vector<1x2x7xf32>
    %361 = vector.shape_cast %360 : vector<1x2x7xf32> to vector<2x7xf32>
    %362 = vector.shape_cast %359 : vector<2x7xf32> to vector<1x2x7xf32>
    tpu.vector_store %arg2[%c5_21, %c0_22, %c0_23], %362 {strides = array<i32>} : memref<8x2x7xf32, #tpu.memory_space<vmem>>, vector<1x2x7xf32>,
    %c76 = arith.constant 76 : index
    %363 = memref.load %arg1[%c76] : memref<92xf32, #tpu.memory_space<smem>>
    %364 = vector.broadcast %363 : f32 to vector<2x7xf32>
    %365 = arith.mulf %110, %364 : vector<2x7xf32>
    %c90 = arith.constant 90 : index
    %366 = memref.load %arg1[%c90] : memref<92xf32, #tpu.memory_space<smem>>
    %367 = vector.broadcast %366 : f32 to vector<2x7xf32>
    %368 = arith.addf %365, %367 : vector<2x7xf32>
    %c77 = arith.constant 77 : index
    %369 = memref.load %arg1[%c77] : memref<92xf32, #tpu.memory_space<smem>>
    %370 = vector.broadcast %369 : f32 to vector<2x7xf32>
    %371 = arith.mulf %370, %152 : vector<2x7xf32>
    %372 = arith.addf %368, %371 : vector<2x7xf32>
    %c78 = arith.constant 78 : index
    %373 = memref.load %arg1[%c78] : memref<92xf32, #tpu.memory_space<smem>>
    %374 = vector.broadcast %373 : f32 to vector<2x7xf32>
    %375 = arith.mulf %374, %194 : vector<2x7xf32>
    %376 = arith.addf %372, %375 : vector<2x7xf32>
    %c79 = arith.constant 79 : index
    %377 = memref.load %arg1[%c79] : memref<92xf32, #tpu.memory_space<smem>>
    %378 = vector.broadcast %377 : f32 to vector<2x7xf32>
    %379 = arith.mulf %378, %236 : vector<2x7xf32>
    %380 = arith.addf %376, %379 : vector<2x7xf32>
    %c6_24 = arith.constant 6 : index
    %c0_25 = arith.constant 0 : index
    %c0_26 = arith.constant 0 : index
    %381 = vector.load %arg2[%c6_24, %c0_25, %c0_26] : memref<8x2x7xf32, #tpu.memory_space<vmem>>, vector<1x2x7xf32>
    %382 = vector.shape_cast %381 : vector<1x2x7xf32> to vector<2x7xf32>
    %383 = vector.shape_cast %380 : vector<2x7xf32> to vector<1x2x7xf32>
    tpu.vector_store %arg2[%c6_24, %c0_25, %c0_26], %383 {strides = array<i32>} : memref<8x2x7xf32, #tpu.memory_space<vmem>>, vector<1x2x7xf32>,
    %c80 = arith.constant 80 : index
    %384 = memref.load %arg1[%c80] : memref<92xf32, #tpu.memory_space<smem>>
    %385 = vector.broadcast %384 : f32 to vector<2x7xf32>
    %386 = arith.mulf %110, %385 : vector<2x7xf32>
    %c91 = arith.constant 91 : index
    %387 = memref.load %arg1[%c91] : memref<92xf32, #tpu.memory_space<smem>>
    %388 = vector.broadcast %387 : f32 to vector<2x7xf32>
    %389 = arith.addf %386, %388 : vector<2x7xf32>
    %c81 = arith.constant 81 : index
    %390 = memref.load %arg1[%c81] : memref<92xf32, #tpu.memory_space<smem>>
    %391 = vector.broadcast %390 : f32 to vector<2x7xf32>
    %392 = arith.mulf %391, %152 : vector<2x7xf32>
    %393 = arith.addf %389, %392 : vector<2x7xf32>
    %c82 = arith.constant 82 : index
    %394 = memref.load %arg1[%c82] : memref<92xf32, #tpu.memory_space<smem>>
    %395 = vector.broadcast %394 : f32 to vector<2x7xf32>
    %396 = arith.mulf %395, %194 : vector<2x7xf32>
    %397 = arith.addf %393, %396 : vector<2x7xf32>
    %c83 = arith.constant 83 : index
    %398 = memref.load %arg1[%c83] : memref<92xf32, #tpu.memory_space<smem>>
    %399 = vector.broadcast %398 : f32 to vector<2x7xf32>
    %400 = arith.mulf %399, %236 : vector<2x7xf32>
    %401 = arith.addf %397, %400 : vector<2x7xf32>
    %c7_27 = arith.constant 7 : index
    %c0_28 = arith.constant 0 : index
    %c0_29 = arith.constant 0 : index
    %402 = vector.load %arg2[%c7_27, %c0_28, %c0_29] : memref<8x2x7xf32, #tpu.memory_space<vmem>>, vector<1x2x7xf32>
    %403 = vector.shape_cast %402 : vector<1x2x7xf32> to vector<2x7xf32>
    %404 = vector.shape_cast %401 : vector<2x7xf32> to vector<1x2x7xf32>
    tpu.vector_store %arg2[%c7_27, %c0_28, %c0_29], %404 {strides = array<i32>} : memref<8x2x7xf32, #tpu.memory_space<vmem>>, vector<1x2x7xf32>,
    return
  }
}

</mosaic_0001>

<bundles_post_ra>
// kernel: _network_pallas_fn.1
= control target key start
LH: loop header
LB: loop body
LE: loop exit
PB: predicated region body
PF: predicated region fallthrough
CT: control target
= control target key end

     0   :  { %s1151_s0 = inlined_call_operand.vmem [shape: f32[2,2,8], index: 0, kind: input, shape index: {}]   ;;  %s1152_s1 = inlined_call_operand.vmem [shape: f32[92], index: 1, kind: input, shape index: {}]   ;;  %s1153_s2 = inlined_call_operand.vmem [shape: f32[8,2,7], index: 2, kind: output, shape index: {}]  }
   0x1   :  { %1192 = sst [smem:[#allocation31_spill]] %s1153_s2 }
   0x2   :  { %7 = vsyncpa [#allocation3], 0  ;;  %s16_s11 = sshll.u32 %s1152_s1, 4  ;;  %s17_s11 = int_to_ptr.vmem [resolvable:$true] %s16_s11 }
   0x3   :  { %s556_s12 = scalar_lea.vmem %s17_s11, 16  ;;  %p561_p1 = scmp.lt.s32.totalorder %s17_s11, %s17_s11 }
   0x4   :  { %p557_p0 = scmp.ne.s32.totalorder %s17_s11, %s556_s12  ;;  %p562_p2 = scmp.lt.s32.totalorder %s556_s12, %s556_s12 }
   0x6   :  { %p563_p3 = por %p562_p2, %p561_p1 }
   0x8   :  { %p564_p4 = pnand %p563_p3, %p557_p0 }
   0xa   :  { %567 = shalt.err (!%p564_p4)
}
   0xb   :  { %s570_s13 = smov [#allocation2]  }
   0xc   :  { %19 = dma.vmem_to_smem %s17_s11, 16, %s570_s13, [#allocation3]  }
   0xd   :  { %568 = dma.done.wait [#allocation3], 16  }
   0xe   :  { %569 = vsyncadd [#allocation3], 4294967280 }
   0xf   :  { %23 = sfence }
  0x10   :  { %s456_s14 = sld [smem:[#allocation2 + $0x2]]  ;;  %s455_s15 = sld [smem:[#allocation2 + $0x1]]  ;;  %v24_v0 = vld [vmem:[%s1151_s0] sm:$0x3]  ;;  %v454_v1 = vld [vmem:[%s1151_s0 + $0x2] sm:$0x3] }
  0x11   :  { %s460_s16 = sld [smem:[#allocation2 + $0x5]]  ;;  %s459_s17 = sld [smem:[#allocation2 + $0x4]]  ;;  %vm95_vm0 = vcmask 7168   ;;  %vm105_vm1 = vcmask 48128   ;;  %vm307_vm2 = vcmask 50176  }
  0x12   :  { %s591_s18 = sld [smem:[#allocation2]]  ;;  %s599_s22 = sld [smem:[#allocation2 + $0x3]] }
  0x13   :  { %s571_s23 = smov 127   ;;  %s457_s0 = sld [smem:[#allocation2 + $0x6]] }
  0x14   :  { %s461_s24 = sld [smem:[#allocation2 + $0x7]]  ;;  %s572_s25 = smov 1  }
  0x15   :  { %s625_s26 = sld [smem:[#allocation2 + $0xa]]  ;;  %s627_s27 = sld [smem:[#allocation2 + $0x14]] }
  0x16   :  { %v36_v2 = vstv %s456_s14  ;;  %v33_v4 = vstv %s455_s15  ;;  %s629_s28 = sld [smem:[#allocation2 + $0x1e]]  ;;  %s631_s29 = sld [smem:[#allocation2 + $0x28]] }
  0x17   :  { %v37_v3 = vmul.f32 %v36_v2, %v24_v0  ;;  %v52_v5 = vmul.f32 %v454_v1, %v36_v2  ;;  %v68_v6 = vstv %s460_s16  ;;  %v46_v7 = vmul.f32 %v33_v4, %v24_v0  ;;  %s633_s30 = sld [smem:[#allocation2 + $0xb]]  ;;  %s635_s3 = sld [smem:[#allocation2 + $0x15]] }
  0x18   :  { %v69_v8 = vmul.f32 %v68_v6, %v24_v0  ;;  %v65_v9 = vstv %s459_s17  ;;  %v31_v10 = vstv %s591_s18  ;;  %v34_v11 = vmul.f32 %v454_v1, %v33_v4  ;;  %s637_s4 = sld [smem:[#allocation2 + $0x1f]]  ;;  %s639_s5 = sld [smem:[#allocation2 + $0x29]] }
  0x19   :  { %39 = vrot.lane.b32.xlu0 %v37_v3, %s571_s23  ;;  %54 = vrot.lane.b32.xlu1 %v52_v5, %s571_s23  ;;  %v32_v12 = vmul.f32 %v31_v10, %v24_v0  ;;  %v63_v13 = vstv %s599_s22  ;;  %v66_v14 = vmul.f32 %v454_v1, %v65_v9  ;;  %v78_v17 = vmul.f32 %v65_v9, %v24_v0  ;;  %s641_s6 = sld [smem:[#allocation2 + $0xf]]  ;;  %s643_s7 = sld [smem:[#allocation2 + $0x19]] }
  0x1a   :  { %v64_v15 = vmul.f32 %v63_v13, %v24_v0  ;;  %v84_v18 = vmul.f32 %v454_v1, %v68_v6  ;;  %v43_v20 = vstv %s457_s0  ;;  %v45_v24 = vmul.f32 %v454_v1, %v31_v10  ;;  %s645_s8 = sld [smem:[#allocation2 + $0x10]]  ;;  %s647_s9 = sld [smem:[#allocation2 + $0x1a]] }
  0x1b   :  { %v35_v16 = vadd.f32 %v34_v11, %v32_v12  ;;  %v77_v29 = vmul.f32 %v454_v1, %v63_v13  ;;  %v75_v32 = vstv %s461_s24  ;;  %s649_s10 = sld [smem:[#allocation2 + $0x23]]  ;;  %s651_s11 = sld [smem:[#allocation2 + $0x24]]  ;;  %v132_v40 = vstv %s625_s26 }
  0x1c   :  { %v67_v19 = vadd.f32 %v66_v14, %v64_v15  ;;  %s653_s12 = sld [smem:[#allocation2 + $0x2d]]  ;;  %s655_s13 = sld [smem:[#allocation2 + $0x2e]]  ;;  %v174_v41 = vstv %s627_s27  ;;  %v216_v42 = vstv %s629_s28  ;;  %v258_v43 = vstv %s631_s29 }
  0x1d   :  { %48 = vrot.lane.b32.xlu0 %v46_v7, %s571_s23  ;;  %71 = vrot.lane.b32.xlu1 %v69_v8, %s571_s23  ;;  %1193 = sst [smem:[#allocation5_spill]] %s633_s30  ;;  %s661_s16 = sld [smem:[#allocation2 + $0x12]]  ;;  %v136_v44 = vstv %s633_s30  ;;  %v178_v45 = vstv %s635_s3 }
  0x1e   :  { %1194 = sst [smem:[#allocation6_spill]] %s635_s3  ;;  %s657_s14 = sld [smem:[#allocation2 + $0x8]]  ;;  %v220_v46 = vstv %s637_s4  ;;  %v262_v47 = vstv %s639_s5 }
  0x1f   :  { %1195 = sst [smem:[#allocation7_spill]] %s637_s4  ;;  %s659_s15 = sld [smem:[#allocation2 + $0x30]]  ;;  %v152_v48 = vstv %s641_s6  ;;  %v194_v50 = vstv %s643_s7 }
  0x20   :  { %1196 = sst [smem:[#allocation8_spill]] %s639_s5  ;;  %s663_s17 = sld [smem:[#allocation2 + $0x31]]  ;;  %v156_v49 = vstv %s645_s8  ;;  %v198_v51 = vstv %s647_s9 }
  0x21   :  { %80 = vrot.lane.b32.xlu0 %v78_v17, %s571_s23  ;;  %86 = vrot.lane.b32.xlu1 %v84_v18, %s571_s23  ;;  %1197 = sst [smem:[#allocation9_spill]] %s651_s11  ;;  %s667_s1 = sld [smem:[#allocation2 + $0x32]]  ;;  %v236_v52 = vstv %s649_s10  ;;  %v240_v53 = vstv %s651_s11 }
  0x22   :  { %s665_s18 = sld [smem:[#allocation2 + $0x1c]]  ;;  %s669_s19 = sld [smem:[#allocation2 + $0x26]]  ;;  %v278_v54 = vstv %s653_s12  ;;  %v282_v55 = vstv %s655_s13 }
  0x23   :  { %s671_s20 = sld [smem:[#allocation2 + $0x33]]  ;;  %s673_s21 = sld [smem:[#allocation2 + $0xc]]  ;;  %v164_v58 = vstv %s661_s16 }
  0x24   :  { %s675_s22 = sld [smem:[#allocation2 + $0x16]]  ;;  %s679_s0 = sld [smem:[#allocation2 + $0x2a]]  ;;  %v122_v56 = vstv %s657_s14 }
  0x25   :  { %1198 = sst [smem:[#allocation10_spill]] %s659_s15  ;;  %s681_s24 = sld [smem:[#allocation2 + $0x9]]  ;;  %v125_v57 = vstv %s659_s15 }
  0x26   :  { %1199 = sst [smem:[#allocation11_spill]] %s663_s17  ;;  %s685_s2 = sld [smem:[#allocation2 + $0x1d]]  ;;  %v167_v59 = vstv %s663_s17 }
  0x27   :  { %1200 = sst [smem:[#allocation12_spill]] %s667_s1  ;;  %s707_s26 = sld [smem:[#allocation2 + $0x1b]]  ;;  %v209_v61 = vstv %s667_s1 }
  0x28   :  { %1201 = sst [smem:[#allocation13_spill]] %s669_s19  ;;  %s687_s19 = sld [smem:[#allocation2 + $0x27]]  ;;  %v206_v60 = vstv %s665_s18 }
  0x29   :  { %1202 = sst [smem:[#allocation14_spill]] %s671_s20  ;;  %s689_s20 = sld [smem:[#allocation2 + $0xd]] }
  0x2a   :  { %1203 = sst [smem:[#allocation15_spill]] %s673_s21  ;;  %s691_s21 = sld [smem:[#allocation2 + $0x17]]  ;;  %v182_v1 = vstv %s675_s22 }
  0x2b   :  { %1204 = sst [smem:[#allocation16_spill]] %s675_s22  ;;  %s709_s27 = sld [smem:[#allocation2 + $0x25]] }
  0x2c   :  { %1206 = sst [smem:[#allocation18_spill]] %s679_s0  ;;  %s697_s0 = sld [smem:[#allocation2 + $0x21]]  ;;  %v212_v6 = vstv %s685_s2 }
  0x2d   :  { %1207 = sst [smem:[#allocation19_spill]] %s681_s24  ;;  %s699_s24 = sld [smem:[#allocation2 + $0x2b]]  ;;  %v202_v17 = vstv %s707_s26 }
  0x2e   :  { %1209 = sst [smem:[#allocation21_spill]] %s685_s2  ;;  %s711_s28 = sld [smem:[#allocation2 + $0x2f]]  ;;  %v254_v7 = vstv %s687_s19 }
  0x2f   :  { %1210 = sst [smem:[#allocation22_spill]] %s687_s19  ;;  %s1217_s29 = sld [smem:[#allocation13_spill]]  ;;  %v144_v12 = vstv %s689_s20 }
  0x30   :  { %1211 = sst [smem:[#allocation23_spill]] %s689_s20  ;;  %s1218_s5 = sld [smem:[#allocation14_spill]] }
  0x31   :  { %1212 = sst [smem:[#allocation24_spill]] %s691_s21  ;;  %s705_s21 = sld [smem:[#allocation2 + $0x11]]  ;;  %v244_v18 = vstv %s709_s27 }
  0x32   :  { %1214 = sst [smem:[#allocation26_spill]] %s707_s26  ;;  %s717_s4 = sld [smem:[#allocation2 + $0xe]]  ;;  %v228_v14 = vstv %s697_s0 }
  0x33   :  { %1215 = sst [smem:[#allocation27_spill]] %s709_s27  ;;  %s719_s3 = sld [smem:[#allocation2 + $0x18]]  ;;  %v270_v15 = vstv %s699_s24 }
  0x34   :  { %1216 = sst [smem:[#allocation28_spill]] %s711_s28  ;;  %s1219_s30 = sld [smem:[#allocation15_spill]] }
  0x35   :  { %s1220_s28 = sld [smem:[#allocation18_spill]]  ;;  %s1221_s6 = sld [smem:[#allocation19_spill]]  ;;  %v248_v62 = vstv %s1217_s29 }
  0x36   :  { %s729_s7 = sld [smem:[#allocation2 + $0x22]]  ;;  %v251_v63 = vstv %s1218_s5  ;;  %s735_s10 = sld [smem:[#allocation2 + $0x2c]] }
  0x37   :  { %1213 = sst [smem:[#allocation25_spill]] %s705_s21  ;;  %s1224_s17 = sld [smem:[#allocation24_spill]] }
  0x38   :  { %s737_s11 = sld [smem:[#allocation2 + $0x34]]  ;;  %s745_s15 = sld [smem:[#allocation2 + $0x35]] }
  0x39   :  { %s743_s12 = sld [smem:[#allocation2 + $0x54]]  ;;  %s751_s5 = sld [smem:[#allocation2 + $0x36]] }
  0x3a   :  { %v140_v0 = vstv %s1219_s30  ;;  %s753_s30 = sld [smem:[#allocation2 + $0x37]]  ;;  %s769_s22 = sld [smem:[#allocation2 + $0x55]] }
  0x3b   :  { %v266_v3 = vstv %s1220_s28  ;;  %v128_v4 = vstv %s1221_s6  ;;  %s1226_s28 = sld [smem:[#allocation28_spill]]  ;;  %s777_s6 = sld [smem:[#allocation2 + $0x3a]] }
  0x3c   :  { %1222 = sst [smem:[#allocation13_spill]] %s735_s10  ;;  %s785_s20 = sld [smem:[#allocation2 + $0x3c]] }
  0x3d   :  { %v186_v13 = vstv %s1224_s17  ;;  %s797_s27 = sld [smem:[#allocation2 + $0x3d]]  ;;  %s827_s2 = sld [smem:[#allocation2 + $0x3e]] }
  0x3e   :  { %s845_s19 = sld [smem:[#allocation2 + $0x3f]]  ;;  %s895_s9 = sld [smem:[#allocation2 + $0x41]] }
  0x3f   :  { %1223 = sst [smem:[#allocation29_spill]] %s743_s12  ;;  %s893_s8 = sld [smem:[#allocation2 + $0x57]] }
  0x40   :  { %1225 = sst [smem:[#allocation24_spill]] %s753_s30  ;;  %s902_s14 = sld [smem:[#allocation2 + $0x42]] }
  0x41   :  { %s1235_s1 = sld [smem:[#allocation24_spill]]  ;;  %s906_s13 = sld [smem:[#allocation2 + $0x44]] }
  0x42   :  { %s904_s26 = sld [smem:[#allocation2 + $0x43]]  ;;  %s913_s16 = sld [smem:[#allocation2 + $0x58]] }
  0x43   :  { %1234 = sst [smem:[#allocation6_spill]] %s827_s2  ;;  %s915_s18 = sld [smem:[#allocation2 + $0x45]] }
  0x44   :  { %1237 = sst [smem:[#allocation7_spill]] %s845_s19  ;;  %s932_s29 = sld [smem:[#allocation2 + $0x47]] }
  0x45   :  { %1249 = sst [smem:[#allocation9_spill]] %s893_s8  ;;  %s940_s17 = sld [smem:[#allocation2 + $0x59]] }
  0x46   :  { %1251 = sst [smem:[#allocation24_spill]] %s895_s9  ;;  %s944_s0 = sld [smem:[#allocation2 + $0x49]] }
  0x48   :  { %1253 = sst [smem:[#allocation10_spill]] %s904_s26 }
  0x49   :  { %1256 = sst [smem:[#allocation11_spill]] %s915_s18 }
  0x8b   :  { %v40_v21 = vpop.permute.xlu0 %39  ;;  %v55_v22 = vpop.permute.xlu1 %54 }
  0x8c   :  { %v42_v23 = vadd.f32 %v40_v21, %v35_v16  ;;  %v160_v16 = vstv %s705_s21  ;;  %s795_s21 = sld [smem:[#allocation2 + $0x56]] }
  0x8e   :  { %v609_v25 = vadd.f32 %v43_v20, %v42_v23 }
  0x8f   :  { %v49_v26 = vpop.permute.xlu0 %48  ;;  %v72_v27 = vpop.permute.xlu1 %71 }
  0x90   :  { %v51_v28 = vadd.f32 %v49_v26, %v45_v24  ;;  %92 = vrot.lane.b32.xlu0 %v609_v25, %s572_s25  ;;  %v74_v31 = vadd.f32 %v72_v27, %v67_v19  ;;  %v756_v8 = vmul.f32 %v132_v40, %v609_v25  ;;  %v759_v9 = vmul.f32 %v174_v41, %v609_v25 }
  0x91   :  { %v762_v10 = vmul.f32 %v216_v42, %v609_v25  ;;  %v765_v11 = vmul.f32 %v258_v43, %v609_v25  ;;  %v286_v19 = vstv %s1226_s28  ;;  %v232_v26 = vstv %s729_s7  ;;  %s847_s28 = sld [smem:[#allocation2 + $0x40]]  ;;  %s962_s7 = sld [smem:[#allocation2 + $0x5a]] }
  0x92   :  { %v57_v30 = vadd.f32 %v55_v22, %v51_v28  ;;  %v616_v37 = vadd.f32 %v75_v32, %v74_v31  ;;  %v190_v22 = vstv %s719_s3  ;;  %1233 = sst [smem:[#allocation5_spill]] %s795_s21  ;;  %v274_v31 = vstv %s735_s10  ;;  %s956_s10 = sld [smem:[#allocation2 + $0x4a]] }
  0x93   :  { %v81_v33 = vpop.permute.xlu0 %80  ;;  %v87_v34 = vpop.permute.xlu1 %86  ;;  %v290_v40 = vstv %s737_s11  ;;  %v293_v41 = vstv %s743_s12  ;;  %s960_s3 = sld [smem:[#allocation2 + $0x4c]]  ;;  %s967_s12 = sld [smem:[#allocation2 + $0x4d]] }
  0x94   :  { %v612_v35 = vadd.f32 %v57_v30, %v43_v20  ;;  %102 = vrot.lane.b32.xlu0 %v609_v25, %s571_s23  ;;  %v83_v36 = vadd.f32 %v81_v33, %v77_v29  ;;  %v148_v20 = vstv %s717_s4  ;;  %v789_v21 = vmul.f32 %v152_v48, %v616_v37  ;;  %s958_s4 = sld [smem:[#allocation2 + $0x4b]]  ;;  %s1033_s11 = sld [smem:[#allocation2 + $0x51]] }
  0x95   :  { %v793_v23 = vmul.f32 %v194_v50, %v616_v37  ;;  %v811_v27 = vmul.f32 %v236_v52, %v616_v37  ;;  %v304_v48 = vstv %s1235_s1  ;;  %s1274_s1 = sld [smem:[#allocation31_spill]] }
  0x96   :  { %98 = vrot.lane.b32.xlu1 %v612_v35, %s572_s25  ;;  %v89_v38 = vadd.f32 %v87_v34, %v83_v36  ;;  %v802_v24 = vmul.f32 %v136_v44, %v612_v35  ;;  %v807_v25 = vmul.f32 %v178_v45, %v612_v35  ;;  %v816_v29 = vmul.f32 %v220_v46, %v612_v35 }
  0x97   :  { %v821_v30 = vmul.f32 %v262_v47, %v612_v35  ;;  %1238 = sst [smem:[#allocation8_spill]] %s847_s28  ;;  %v296_v45 = vstv %s745_s15  ;;  %v300_v47 = vstv %s751_s5 }
  0x98   :  { %v619_v39 = vadd.f32 %v89_v38, %v75_v32  ;;  %v825_v32 = vmul.f32 %v278_v54, %v616_v37 }
  0x9a   :  { %108 = vrot.lane.b32.xlu1 %v616_v37, %s572_s25  ;;  %113 = vrot.lane.b32.xlu0 %v619_v39, %s572_s25  ;;  %s683_s25 = sld [smem:[#allocation2 + $0x13]]  ;;  %v833_v34 = vmul.f32 %v156_v49, %v619_v39  ;;  %v838_v35 = vmul.f32 %v198_v51, %v619_v39  ;;  %v843_v36 = vmul.f32 %v240_v53, %v619_v39  ;;  %v313_v49 = vstv %s769_s22  ;;  %s1057_s22 = sld [smem:[#allocation2 + $0x4f]] }
  0x9b   :  { %v854_v38 = vmul.f32 %v282_v55, %v619_v39  ;;  %v320_v51 = vstv %s777_s6 }
  0x9e   :  { %117 = vrot.lane.b32.xlu1 %v616_v37, %s571_s23  ;;  %s677_s23 = sld [smem:[#allocation2 + $0x20]] }
  0xa0   :  { %1208 = sst [smem:[#allocation20_spill]] %s683_s25  ;;  %v170_v5 = vstv %s683_s25  ;;  %s775_s25 = sld [smem:[#allocation2 + $0x39]] }
  0xa4   :  { %1205 = sst [smem:[#allocation17_spill]] %s677_s23  ;;  %v224_v2 = vstv %s677_s23  ;;  %s767_s23 = sld [smem:[#allocation2 + $0x38]] }
  0xa6   :  { %v316_v50 = vstv %s775_s25 }
  0xaa   :  { %1227 = sst [smem:[#allocation30_spill]] %s767_s23  ;;  %s783_s23 = sld [smem:[#allocation2 + $0x3b]] }
  0xab   :  { %s1236_s30 = sld [smem:[#allocation30_spill]] }
  0xac   :  { %1252 = sst [smem:[#allocation30_spill]] %s902_s14 }
  0xb1   :  { %v310_v39 = vstv %s1236_s30 }
 0x102   :  { %v93_v28 = vpop.permute.xlu0 %92 }
 0x103   :  { %v96_v33 = vsel %vm95_vm0, 0.0, %v93_v28 }
 0x104   :  { %v123_v37 = vmul.f32 %v122_v56, %v96_v33  ;;  %v165_v42 = vmul.f32 %v164_v58, %v96_v33  ;;  %v207_v43 = vmul.f32 %v206_v60, %v96_v33  ;;  %v249_v44 = vmul.f32 %v248_v62, %v96_v33 }
 0x105   :  { %v333_v58 = vstv %s795_s21  ;;  %v336_v60 = vstv %s797_s27  ;;  %s922_s21 = sld [smem:[#allocation2 + $0x46]] }
 0x106   :  { %v103_v46 = vpop.permute.xlu0 %102  ;;  %v126_v54 = vadd.f32 %v125_v57, %v123_v37  ;;  %v168_v62 = vadd.f32 %v167_v59, %v165_v42  ;;  %v210_v28 = vadd.f32 %v209_v61, %v207_v43  ;;  %v252_v33 = vadd.f32 %v251_v63, %v249_v44 }
 0x107   :  { %v106_v55 = vsel %vm105_vm1, %v103_v46, 0.0  ;;  %v340_v61 = vstv %s827_s2  ;;  %v344_v63 = vstv %s845_s19  ;;  %v350_v42 = vstv %s847_s28  ;;  %s934_s19 = sld [smem:[#allocation2 + $0x48]]  ;;  %s976_s28 = sld [smem:[#allocation2 + $0x5b]] }
 0x108   :  { %v99_v56 = vpop.permute.xlu1 %98  ;;  %v141_v59 = vmul.f32 %v140_v0, %v106_v55  ;;  %v183_v0 = vmul.f32 %v182_v1, %v106_v55 }
 0x109   :  { %v101_v52 = vsel %vm95_vm0, 0.0, %v99_v56 }
 0x10a   :  { %v129_v53 = vmul.f32 %v128_v4, %v101_v52  ;;  %v171_v57 = vmul.f32 %v170_v5, %v101_v52  ;;  %v213_v37 = vmul.f32 %v212_v6, %v101_v52  ;;  %v255_v46 = vmul.f32 %v254_v7, %v101_v52 }
 0x10b   :  { %v225_v52 = vmul.f32 %v224_v2, %v106_v55  ;;  %v267_v2 = vmul.f32 %v266_v3, %v106_v55 }
 0x10c   :  { %v130_v4 = vadd.f32 %v129_v53, %v126_v54  ;;  %v172_v5 = vadd.f32 %v171_v57, %v168_v62  ;;  %v214_v6 = vadd.f32 %v213_v37, %v210_v28  ;;  %v256_v7 = vadd.f32 %v255_v46, %v252_v33  ;;  %v109_v43 = vpop.permute.xlu1 %108  ;;  %v114_v44 = vpop.permute.xlu0 %113 }
 0x10d   :  { %v111_v56 = vsel %vm95_vm0, 0.0, %v109_v43  ;;  %v116_v53 = vsel %vm95_vm0, 0.0, %v114_v44  ;;  %v353_v46 = vstv %s893_s8  ;;  %v376_v43 = vstv %s915_s18  ;;  %s974_s8 = sld [smem:[#allocation2 + $0x50]] }
 0x10e   :  { %v134_v54 = vadd.f32 %v756_v8, %v130_v4  ;;  %v176_v62 = vadd.f32 %v759_v9, %v172_v5  ;;  %v218_v28 = vadd.f32 %v762_v10, %v214_v6  ;;  %v260_v1 = vadd.f32 %v765_v11, %v256_v7 }
 0x10f   :  { %v145_v33 = vmul.f32 %v144_v12, %v111_v56  ;;  %v187_v57 = vmul.f32 %v186_v13, %v111_v56  ;;  %v229_v8 = vmul.f32 %v228_v14, %v111_v56  ;;  %v271_v12 = vmul.f32 %v270_v15, %v111_v56 }
 0x110   :  { %v138_v9 = vadd.f32 %v802_v24, %v134_v54  ;;  %v180_v10 = vadd.f32 %v807_v25, %v176_v62  ;;  %v222_v11 = vadd.f32 %v816_v29, %v218_v28  ;;  %v264_v3 = vadd.f32 %v821_v30, %v260_v1  ;;  %v118_v30 = vpop.permute.xlu1 %117 }
 0x111   :  { %v149_v13 = vmul.f32 %v148_v20, %v116_v53  ;;  %v191_v14 = vmul.f32 %v190_v22, %v116_v53  ;;  %v233_v24 = vmul.f32 %v232_v26, %v116_v53  ;;  %v356_v4 = vstv %s895_s9 }
 0x112   :  { %v142_v55 = vadd.f32 %v141_v59, %v138_v9  ;;  %v184_v25 = vadd.f32 %v183_v0, %v180_v10  ;;  %v226_v37 = vadd.f32 %v225_v52, %v222_v11  ;;  %v268_v29 = vadd.f32 %v267_v2, %v264_v3 }
 0x113   :  { %v360_v15 = vstv %s902_s14  ;;  %v364_v5 = vstv %s904_s26  ;;  %v370_v6 = vstv %s906_s13  ;;  %v373_v7 = vstv %s913_s16  ;;  %s969_s26 = sld [smem:[#allocation2 + $0x4e]] }
 0x114   :  { %v146_v20 = vadd.f32 %v145_v33, %v142_v55  ;;  %v188_v22 = vadd.f32 %v187_v57, %v184_v25  ;;  %v230_v26 = vadd.f32 %v229_v8, %v226_v37  ;;  %v272_v59 = vadd.f32 %v271_v12, %v268_v29 }
 0x115   :  { %v275_v44 = vmul.f32 %v274_v31, %v116_v53  ;;  %v120_v0 = vsel %vm105_vm1, %v118_v30, 0.0  ;;  %v380_v62 = vstv %s922_s21  ;;  %v384_v28 = vstv %s932_s29 }
 0x116   :  { %v150_v52 = vadd.f32 %v149_v13, %v146_v20  ;;  %v192_v56 = vadd.f32 %v191_v14, %v188_v22  ;;  %v234_v54 = vadd.f32 %v233_v24, %v230_v26  ;;  %v390_v1 = vstv %s934_s19 }
 0x117   :  { %v276_v2 = vadd.f32 %v275_v44, %v272_v59  ;;  %v393_v31 = vstv %s940_s17  ;;  %v161_v8 = vmul.f32 %v160_v16, %v120_v0  ;;  %v203_v9 = vmul.f32 %v202_v17, %v120_v0 }
 0x118   :  { %v154_v53 = vadd.f32 %v789_v21, %v150_v52  ;;  %v196_v33 = vadd.f32 %v793_v23, %v192_v56  ;;  %v238_v57 = vadd.f32 %v811_v27, %v234_v54  ;;  %v396_v10 = vstv %s944_s0 }
 0x119   :  { %v280_v11 = vadd.f32 %v825_v32, %v276_v2  ;;  %v245_v3 = vmul.f32 %v244_v18, %v120_v0  ;;  %v287_v16 = vmul.f32 %v286_v19, %v120_v0  ;;  %v400_v17 = vstv %s956_s10 }
 0x11a   :  { %v158_v12 = vadd.f32 %v833_v34, %v154_v53  ;;  %v200_v21 = vadd.f32 %v838_v35, %v196_v33  ;;  %v242_v23 = vadd.f32 %v843_v36, %v238_v57  ;;  %v404_v27 = vstv %s958_s4 }
 0x11b   :  { %v284_v32 = vadd.f32 %v854_v38, %v280_v11  ;;  %v410_v18 = vstv %s960_s3  ;;  %v413_v19 = vstv %s962_s7  ;;  %v416_v36 = vstv %s967_s12 }
 0x11c   :  { %v1002_v34 = vadd.f32 %v161_v8, %v158_v12  ;;  %v1004_v13 = vadd.f32 %v203_v9, %v200_v21  ;;  %v1006_v35 = vadd.f32 %v245_v3, %v242_v23  ;;  %v420_v14 = vstv %s969_s26 }
 0x11d   :  { %v1011_v38 = vadd.f32 %v287_v16, %v284_v32  ;;  %v430_v24 = vstv %s974_s8  ;;  %v433_v55 = vstv %s976_s28  ;;  %v424_v23 = vstv %s1057_s22 }
 0x11e   :  { %v291_v25 = vmul.f32 %v290_v40, %v1002_v34  ;;  %v311_v37 = vmul.f32 %v310_v39, %v1002_v34  ;;  %v297_v29 = vmul.f32 %v296_v45, %v1004_v13  ;;  %v301_v30 = vmul.f32 %v300_v47, %v1006_v35 }
 0x11f   :  { %v305_v20 = vmul.f32 %v304_v48, %v1011_v38  ;;  %v317_v22 = vmul.f32 %v316_v50, %v1004_v13  ;;  %v321_v47 = vmul.f32 %v320_v51, %v1006_v35  ;;  %v1270_v39 = vstv %s785_s20  ;;  %s1064_s20 = sld [smem:[#allocation2 + $0x52]] }
 0x120   :  { %v294_v40 = vadd.f32 %v293_v41, %v291_v25  ;;  %v314_v45 = vadd.f32 %v313_v49, %v311_v37  ;;  %v331_v26 = vmul.f32 %v1270_v39, %v1002_v34  ;;  %v1271_v48 = vstv %s783_s23  ;;  %s1080_s23 = sld [smem:[#allocation2 + $0x53]] }
 0x121   :  { %v325_v59 = vmul.f32 %v1271_v48, %v1011_v38  ;;  %v337_v50 = vmul.f32 %v336_v60, %v1004_v13  ;;  %v341_v41 = vmul.f32 %v340_v61, %v1006_v35  ;;  %v351_v49 = vmul.f32 %v350_v42, %v1002_v34 }
 0x122   :  { %v298_v51 = vadd.f32 %v297_v29, %v294_v40  ;;  %v318_v44 = vadd.f32 %v317_v22, %v314_v45  ;;  %v334_v0 = vadd.f32 %v333_v58, %v331_v26  ;;  %v345_v52 = vmul.f32 %v344_v63, %v1011_v38 }
 0x123   :  { %v354_v60 = vadd.f32 %v353_v46, %v351_v49  ;;  %v357_v61 = vmul.f32 %v356_v4, %v1004_v13  ;;  %v361_v42 = vmul.f32 %v360_v15, %v1006_v35  ;;  %v371_v56 = vmul.f32 %v370_v6, %v1002_v34 }
 0x124   :  { %v302_v54 = vadd.f32 %v301_v30, %v298_v51  ;;  %v322_v58 = vadd.f32 %v321_v47, %v318_v44  ;;  %v338_v2 = vadd.f32 %v337_v50, %v334_v0  ;;  %v365_v63 = vmul.f32 %v364_v5, %v1011_v38 }
 0x125   :  { %v358_v46 = vadd.f32 %v357_v61, %v354_v60  ;;  %v374_v4 = vadd.f32 %v373_v7, %v371_v56  ;;  %v377_v15 = vmul.f32 %v376_v43, %v1004_v13  ;;  %v391_v53 = vmul.f32 %v390_v1, %v1002_v34 }
 0x126   :  { %v306_v6 = vadd.f32 %v305_v20, %v302_v54  ;;  %v326_v33 = vadd.f32 %v325_v59, %v322_v58  ;;  %v342_v57 = vadd.f32 %v341_v41, %v338_v2  ;;  %v381_v8 = vmul.f32 %v380_v62, %v1006_v35 }
 0x127   :  { %v362_v5 = vadd.f32 %v361_v42, %v358_v46  ;;  %v378_v9 = vadd.f32 %v377_v15, %v374_v4  ;;  %v394_v11 = vadd.f32 %v393_v31, %v391_v53  ;;  %v397_v3 = vmul.f32 %v396_v10, %v1004_v13 }
 0x128   :  { %v436_v7 = vstv %s1033_s11  ;;  %308 = vst.msk [vmem:[%s1274_s1] sm:$0x3] %vm307_vm2, %v306_v6  ;;  %516 = vst.msk [vmem:[%s1274_s1 + $0x2] sm:$0x3] %vm307_vm2, %v326_v33  ;;  %v346_v43 = vadd.f32 %v345_v52, %v342_v57  ;;  %v385_v62 = vmul.f32 %v384_v28, %v1011_v38  ;;  %v411_v1 = vmul.f32 %v410_v18, %v1002_v34 }
 0x129   :  { %v366_v31 = vadd.f32 %v365_v63, %v362_v5  ;;  %v382_v10 = vadd.f32 %v381_v8, %v378_v9  ;;  %v398_v12 = vadd.f32 %v397_v3, %v394_v11  ;;  %v401_v21 = vmul.f32 %v400_v17, %v1006_v35 }
 0x12a   :  { %522 = vst.msk [vmem:[%s1274_s1 + $0x4] sm:$0x3] %vm307_vm2, %v346_v43  ;;  %v414_v16 = vadd.f32 %v413_v19, %v411_v1  ;;  %v417_v28 = vmul.f32 %v416_v36, %v1004_v13  ;;  %v431_v32 = vmul.f32 %v430_v24, %v1002_v34  ;;  %v440_v18 = vstv %s1064_s20 }
 0x12b   :  { %528 = vst.msk [vmem:[%s1274_s1 + $0x6] sm:$0x3] %vm307_vm2, %v366_v31  ;;  %v386_v25 = vadd.f32 %v385_v62, %v382_v10  ;;  %v402_v37 = vadd.f32 %v401_v21, %v398_v12  ;;  %v405_v17 = vmul.f32 %v404_v27, %v1011_v38  ;;  %v421_v30 = vmul.f32 %v420_v14, %v1006_v35 }
 0x12c   :  { %v418_v29 = vadd.f32 %v417_v28, %v414_v16  ;;  %v434_v19 = vadd.f32 %v433_v55, %v431_v32  ;;  %v437_v36 = vmul.f32 %v436_v7, %v1004_v13  ;;  %v444_v34 = vstv %s1080_s23 }
 0x12d   :  { %534 = vst.msk [vmem:[%s1274_s1 + $0x8] sm:$0x3] %vm307_vm2, %v386_v25  ;;  %v406_v24 = vadd.f32 %v405_v17, %v402_v37  ;;  %v425_v22 = vmul.f32 %v424_v23, %v1011_v38  ;;  %v441_v27 = vmul.f32 %v440_v18, %v1006_v35  ;;  %v445_v55 = vmul.f32 %v444_v34, %v1011_v38 }
 0x12e   :  { %v422_v20 = vadd.f32 %v421_v30, %v418_v29  ;;  %v438_v40 = vadd.f32 %v437_v36, %v434_v19 }
 0x12f   :  { %540 = vst.msk [vmem:[%s1274_s1 + $0xa] sm:$0x3] %vm307_vm2, %v406_v24 }
 0x130   :  { %v426_v14 = vadd.f32 %v425_v22, %v422_v20  ;;  %v442_v13 = vadd.f32 %v441_v27, %v438_v40 }
 0x132   :  { %546 = vst.msk [vmem:[%s1274_s1 + $0xc] sm:$0x3] %vm307_vm2, %v426_v14  ;;  %v446_v45 = vadd.f32 %v445_v55, %v442_v13 }
 0x134   :  { %552 = vst.msk [vmem:[%s1274_s1 + $0xe] sm:$0x3] %vm307_vm2, %v446_v45 }
 0x135   :  { %453 = vsyncpa [#allocation3], 1 }

</bundles_post_ra>
